<compile_context>
chip_gen: v6e
topology: v6e:2x2x1
jax: 0.10.0
libtpu: 0.0.40
codegen_flags: <defaults>
</compile_context>

<pallas_src>
import functools

import jax
import jax.numpy as jnp
from jax.experimental import pallas as pl
from jax.experimental.pallas import tpu as pltpu


def _mxu_kernel(x_ref, r_ref, o_ref):
    # One matmul performs both the W (lane) replication and the H (row-tile)
    # replication; R is one-hot so the result is exact.
    o_ref[...] = jnp.dot(
        x_ref[...], r_ref[...], preferred_element_type=jnp.float32
    ).astype(o_ref.dtype)


def _generic_kernel(x_ref, o_ref, *, w, sh, sw):
    # Fallback path: separable replication (lane repeat, then row tiling).
    x = x_ref[...]                                            # (mt, w)
    mt = x.shape[0]
    yw = jnp.broadcast_to(x[:, :, None], (mt, w, sw)).reshape(mt, w * sw)
    o_ref[...] = jnp.concatenate([yw] * sh, axis=-1)          # (mt, sh*w*sw)


def _as_int_scales(scale_factor):
    if isinstance(scale_factor, (tuple, list)):
        sh, sw = scale_factor
    else:
        sh = sw = scale_factor

    def to_int(s):
        si = int(round(float(s)))
        if abs(float(s) - si) > 1e-9 or si < 1:
            # TODO(synk): fractional scale factors (index-gather nearest) not implemented.
            raise NotImplementedError(
                "only positive integer scale factors are supported")
        return si

    return to_int(sh), to_int(sw)


def upsample_nearest(x, scale_factor):
    """Nearest-neighbor 2D upsample of an NCHW tensor by integer scale(s)."""
    sh, sw = _as_int_scales(scale_factor)
    n, c, h, w = x.shape
    dtype = x.dtype
    if sh == 1 and sw == 1:
        return x

    m = n * c * h                    # independent input rows
    row_out = sh * w * sw            # output elements produced per input row

    use_mxu = bool(jnp.issubdtype(dtype, jnp.floating)) and w <= 128

    # Fold consecutive input rows into the lane dim so the output block's minor
    # dim reaches >=128 (unmasked full-lane stores) when rows are narrow.
    fold = 1
    if use_mxu:
        while (row_out * fold < 128
               and m % (fold * 2) == 0
               and w * fold * 2 <= 128):
            fold *= 2

    mrows = m // fold
    kdim = w * fold
    nout = row_out * fold

    # Row tile: ~4 MiB of output per block (double-buffers within the default
    # scoped VMEM limit on every generation), multiple of 8 sublanes, and at
    # least two grid steps when there is enough work (megacore / pipelining).
    out_row_bytes = nout * dtype.itemsize
    mt = max(1, (4 * 1024 * 1024) // out_row_bytes)
    mt = min(mt, mrows)
    if mt >= mrows:
        mt = mrows
        if mrows >= 16:
            mt = min(mrows, ((((mrows + 1) // 2) + 7) // 8) * 8)
    else:
        mt = max(8, (mt // 8) * 8)

    grid = ((mrows + mt - 1) // mt,)

    x2 = x.reshape(mrows, kdim)
    out2_shape = jax.ShapeDtypeStruct((mrows, nout), dtype)

    if use_mxu:
        # Block-diagonal one-hot replication matrix:
        #   R[a*w + v, a*row_out + r*(w*sw) + j] = 1  iff  j // sw == v
        rows = jnp.arange(kdim)
        cols = jnp.arange(nout)
        a_r, v = rows // w, rows % w
        a_c, q = cols // row_out, cols % row_out
        rmat = ((a_r[:, None] == a_c[None, :])
                & (v[:, None] == (q[None, :] % (w * sw)) // sw)).astype(dtype)

        out2 = pl.pallas_call(
            _mxu_kernel,
            out_shape=out2_shape,
            grid_spec=pltpu.PrefetchScalarGridSpec(
                num_scalar_prefetch=0,
                grid=grid,
                in_specs=[
                    pl.BlockSpec((mt, kdim), lambda i: (i, 0)),
                    pl.BlockSpec((kdim, nout), lambda i: (0, 0)),
                ],
                out_specs=pl.BlockSpec((mt, nout), lambda i: (i, 0)),
            ),
            compiler_params=pltpu.CompilerParams(
                dimension_semantics=("parallel",),
            ),
        )(x2, rmat)
    else:
        kernel = functools.partial(_generic_kernel, w=w, sh=sh, sw=sw)
        out2 = pl.pallas_call(
            kernel,
            out_shape=out2_shape,
            grid_spec=pltpu.PrefetchScalarGridSpec(
                num_scalar_prefetch=0,
                grid=grid,
                in_specs=[pl.BlockSpec((mt, kdim), lambda i: (i, 0))],
                out_specs=pl.BlockSpec((mt, nout), lambda i: (i, 0)),
            ),
            compiler_params=pltpu.CompilerParams(
                dimension_semantics=("parallel",),
            ),
        )(x2)

    return out2.reshape(n, c, h * sh, w * sw)


class Upsample:
    """JAX/Pallas equivalent of the PyTorch Upsample module (nearest mode)."""

    def __init__(self, scale_factor, mode="nearest"):
        # TODO(synk): 'linear'/'bilinear'/'bicubic' modes not implemented.
        assert mode == "nearest", "only nearest mode implemented"
        self.scale_factor = scale_factor
        self.mode = mode

    def __call__(self, x):
        return upsample_nearest(x, self.scale_factor)


if __name__ == "__main__":
    key = jax.random.PRNGKey(0)
    # Small NCHW input, consistent with the module's conv-style usage.
    x = jax.random.normal(key, (2, 4, 16, 16), dtype=jnp.float32)

    model = Upsample(scale_factor=2, mode="nearest")
    y = model(x)
    y = jax.block_until_ready(y)

    # Reference check against plain-JAX nearest upsample.
    ref = jnp.repeat(jnp.repeat(x, 2, axis=2), 2, axis=3)
    assert y.shape == (2, 4, 32, 32), y.shape
    assert jnp.allclose(y, ref), "mismatch vs reference nearest upsample"

    print("KERNEL_OK")
</pallas_src>

<mosaic_0001>
module attributes {stable_mosaic.version = 11 : i64} {
  func.func @_mxu_kernel(%arg0: i32, %arg1: memref<32x32xf32, #tpu.memory_space<vmem>>, %arg2: memref<32x128xf32, #tpu.memory_space<vmem>>, %arg3: memref<32x128xf32, #tpu.memory_space<vmem>>) attributes {dimension_semantics = [#tpu.dimension_semantics<parallel>], iteration_bounds = array<i64: 2>, scalar_prefetch = 0 : i64, scratch_operands = 0 : i64, tpu.core_type = #tpu.core_type<tc>, window_params = [{transform_indices = @transform_0, window_bounds = array<i64: 32, 32>}, {pipeline_mode = #tpu.pipeline_mode<synchronous>, transform_indices = @transform_1, window_bounds = array<i64: 32, 128>}, {transform_indices = @transform_2, window_bounds = array<i64: 32, 128>}]} {
    %c0 = arith.constant 0 : index
    %c0_0 = arith.constant 0 : index
    %0 = vector.load %arg1[%c0, %c0_0] : memref<32x32xf32, #tpu.memory_space<vmem>>, vector<32x32xf32>
    %c0_1 = arith.constant 0 : index
    %c0_2 = arith.constant 0 : index
    %1 = vector.load %arg2[%c0_1, %c0_2] : memref<32x128xf32, #tpu.memory_space<vmem>>, vector<32x128xf32>
    %cst = arith.constant dense<0.000000e+00> : vector<32x128xf32>
    %2 = tpu.matmul %0, %1, %cst {dimension_numbers = #tpu.dot_dimension_numbers<[1], [0], [0], [1], [0, 0, 1, 1], [], []>} : vector<32x32xf32>, vector<32x128xf32>, vector<32x128xf32> -> vector<32x128xf32>
    %c0_3 = arith.constant 0 : index
    %c0_4 = arith.constant 0 : index
    %3 = vector.load %arg3[%c0_3, %c0_4] : memref<32x128xf32, #tpu.memory_space<vmem>>, vector<32x128xf32>
    tpu.vector_store %arg3[%c0_3, %c0_4], %2 {strides = array<i32>} : memref<32x128xf32, #tpu.memory_space<vmem>>, vector<32x128xf32>,
    return
  }
  func.func @transform_0(%arg0: i32) -> (i32, i32) {
    %c0_i32 = arith.constant 0 : i32
    %c0_i32_0 = arith.constant 0 : i32
    return %arg0, %c0_i32 : i32, i32
  }
  func.func @transform_1(%arg0: i32) -> (i32, i32) {
    %c0_i32 = arith.constant 0 : i32
    %c0_i32_0 = arith.constant 0 : i32
    %c0_i32_1 = arith.constant 0 : i32
    return %c0_i32, %c0_i32_0 : i32, i32
  }
  func.func @transform_2(%arg0: i32) -> (i32, i32) {
    %c0_i32 = arith.constant 0 : i32
    %c0_i32_0 = arith.constant 0 : i32
    return %arg0, %c0_i32 : i32, i32
  }
}

</mosaic_0001>

<bundles_post_ra>
// kernel: tpu_custom_call.1
= control target key start
LH: loop header
LB: loop body
LE: loop exit
PB: predicated region body
PF: predicated region fallthrough
CT: control target
= control target key end

     0   :  { %7 = vsyncpa [#allocation3], 0  ;;  %s612_s0 = inlined_call_operand.vmem [shape: f32[64,32], index: 0, kind: input, shape index: {}]   ;;  %s613_s1 = inlined_call_operand.vmem [shape: f32[32,128], index: 1, kind: input, shape index: {}]   ;;  %s614_s2 = inlined_call_operand.hbm [shape: f32[64,128], index: 2, kind: output, shape index: {}]  }
   0x1   :  { %9 = vsyncpa [#allocation3 + $0x1], 0  ;;  %s499_s9 = smov 0   ;;  %s501_s10 = smov 0  }
   0x2   :  { %s503_s11 = smov 0   ;;  %s505_s12 = smov 0  }
   0x3 LB: > { %s520_s13 = sadd.s32 4294967295, %s479_s12   ;;  %s331_s14 = sadd.s32 4294967294, %s479_s12   ;;  %s479_s12 = sphi %s505_s12, %s620_s12   ;;  %s475_s11 = sphi %s503_s11, %s619_s11   ;;  %s471_s10 = sphi %s501_s10, %s618_s10   ;;  %s467_s9 = sphi %s499_s9, %s617_s9  }
   0x4   : > { %s524_s15 = sadd.s32 1, %s479_s12   ;;  %s69_s16 = sadd.s32 1, %s475_s11 }
   0x5   : > { %s66_s17 = ssub.s32 %s479_s12, %s524_s15  ;;  %p79_p0 = scmp.ne.s32.totalorder %s475_s11, %s471_s10 }
   0x6   : > { %p67_p1 = scmp.eq.s32.totalorder %s66_s17, 0  ;;  %p80_p2 = scmp.eq.s32.totalorder %s520_s13, 1 }
   0x7   : > { %p85_p3 = scmp.ne.s32.totalorder %s471_s10, %s467_s9  ;;  %p86_p4 = scmp.eq.s32.totalorder %s331_s14, 1 }
   0x8   : > { %s535_s18 = scalar_select %p67_p1, %s475_s11, %s69_s16  }
   0x9   : > { %p537_p5 = por %p80_p2, %p79_p0  ;;  %p541_p6 = por %p86_p4, %p85_p3 }
   0xa   : > { %p334_p7 = scmp.ge.s32.totalorder %s479_s12, 1  ;;  %p116_p8 = scmp.lt.s32.totalorder %s479_s12, 3 }
   0xc   : > { %p117_p9 = pnand %p334_p7, %p116_p8 }
   0xd   : > { %s336_s25 = sshll.u32 (!%p117_p9), %s520_s13, 2  ;;  %s135_s6 = sand.u32 (!%p117_p9), 1, %s471_s10  }
   0xe   : > { %120 = sbr.rel (%p117_p9) target bundleno = 238 (0xee), region = 28  ;;  %p139_p10 = scmp.lt.s32.totalorder (!%p117_p9), %s336_s25, 7 }
   0xf   : > { %s335_s7 = sshll.u32 (!%p117_p9), %s135_s6, 5  ;;  %s347_s16 = sshll.u32 (!%p117_p9), %s520_s13, 9 }
  0x10   : > { %s137_s8 = scalar_lea.vmem (!%p117_p9), [#allocation2], %s335_s7  ;;  %s570_s22 = scalar_lea.hbm (!%p117_p9), %s614_s2, %s347_s16 }
  0x11   : > { %s269_s14 = sshll.u32 (!%p117_p9), %s137_s8, 4  ;;  %s572_s23 = scalar_lea.sflag (!%p117_p9), [#allocation3], %s135_s6  ;;  %s565_s14 = int_to_ptr.vmem [resolvable:$true] %s269_s14 }
  0x12   : > { %s419_s13 = scalar_lea.vmem (!%p117_p9), %s565_s14, 512  ;;  %s481_s24 = smov (!%p117_p9), [#allocation2]  }
  0x13   : > { %v152_v0 = vld [vmem:[%s613_s1 + $0x18] sm:$0xff]  ;;  %v151_v1 = vld [vmem:[%s613_s1 + $0x10] sm:$0xff]  ;;  %v150_v2 = vld [vmem:[%s613_s1 + $0x8] sm:$0xff]  ;;  %s622_s25 = smov (!%p139_p10, %s336_s25), 7  ;;  %vm153_vm0 = vcmask 261120   ;;  %p420_p11 = scmp.ne.s32.totalorder %s565_s14, %s419_s13 }
  0x14   : > { %356 = vmatprep.subr.mxu0 %v152_v0  ;;  %370 = vmatprep.subr.mxu1 %v152_v0  ;;  %v149_v3 = vld [vmem:[%s613_s1] sm:$0xff]  ;;  %s337_s30 = sshll.u32 %s622_s25, 3  ;;  %s423_s25 = sshll.u32 %s481_s24, 4  ;;  %s424_s25 = int_to_ptr.vmem [resolvable:$false] %s423_s25 }
  0x15   : > { %357 = vmatpush3.msra.mxu0 %v152_v0  ;;  %374 = vmatpush3.msra.mxu1 %v152_v0  ;;  %s142_s5 = scalar_lea.vmem %s612_s0, %s337_s30  ;;  %p421_p12 = pnand %p420_p11, %p537_p5 }
  0x16   : > { %358 = vmatprep.subr.mxu0 %v151_v1  ;;  %371 = vmatprep.subr.mxu1 %v151_v1  ;;  %v145_v4 = vld [vmem:[%s142_s5] sm:$0xff]  ;;  %v147_v5 = vld [vmem:[%s142_s5 + $0x10] sm:$0xff]  ;;  %v146_v6 = vld [vmem:[%s142_s5 + $0x8] sm:$0xff]  ;;  %s425_s26 = scalar_lea.vmem %s424_s25, 1024  ;;  %p426_p0 = scmp.lt.s32.totalorder %s565_s14, %s424_s25 }
  0x17   : > { %359 = vmatpush3.msra.mxu0 %v151_v1  ;;  %375 = vmatpush3.msra.mxu1 %v151_v1  ;;  %v148_v7 = vld [vmem:[%s142_s5 + $0x18] sm:$0xff]  ;;  %p422_p13 = pneg %p421_p12  ;;  %p427_p1 = scmp.lt.s32.totalorder %s425_s26, %s419_s13 }
  0x18   : > { %360 = vmatprep.subr.mxu0 %v150_v2  ;;  %372 = vmatprep.subr.mxu1 %v150_v2 }
  0x19   : > { %361 = vmatpush3.msra.mxu0 %v150_v2  ;;  %376 = vmatpush3.msra.mxu1 %v150_v2  ;;  %p428_p2 = por %p427_p1, %p426_p0 }
  0x1a   : > { %362 = vmatprep.subr.mxu0 %v149_v3  ;;  %373 = vmatprep.subr.mxu1 %v149_v3 }
  0x1b   : > { %363 = vmatpush3.msra.mxu0 %v149_v3  ;;  %377 = vmatpush3.msra.mxu1 %v149_v3  ;;  %p429_p3 = pnand %p428_p2, %p422_p13 }
  0x1c   : > { %364 = vmatprep.mubr.msk.f32.mxu0 %vm153_vm0, %v145_v4  ;;  %367 = vmatprep.mubr.msk.f32.mxu1 %vm153_vm0, %v147_v5 }
  0x1d   : > { %365 = vmatmul.mubr.msk.f32.vlgmr.msra.gmra.mxu0 %vm153_vm0, %v146_v6  ;;  %368 = vmatmul.mubr.msk.f32.vlgmr.msra.gmra.mxu1 %vm153_vm0, %v148_v7 }
  0xdd   : > { %v366_v8 = vpop.f32.mrf.mxu0  ;;  %v369_v9 = vpop.f32.mrf.mxu1 }
  0xde   : > { %252 = vst [vmem:[%s137_s8 + $0x8] sm:$0xff] %v366_v8  ;;  %254 = vst [vmem:[%s137_s8 + $0x18] sm:$0xff] %v369_v9 }
  0xdf   : > { %v232_v10 = vpop.f32.mrf.mxu0  ;;  %v242_v11 = vpop.f32.mrf.mxu1 }
  0xe0   : > { %251 = vst [vmem:[%s137_s8] sm:$0xff] %v232_v10  ;;  %253 = vst [vmem:[%s137_s8 + $0x10] sm:$0xff] %v242_v11 }
  0xe1   : > { %432 = shalt.err (!%p429_p3)
}
  0xe2   : > { %s433_s27 = scalar_lea.hbm %s570_s22, 512  ;;  %s437_s30 = scalar_lea.hbm %s614_s2, 1024 }
  0xe3   : > { %p434_p4 = scmp.ne.s32.totalorder %s570_s22, %s433_s27  ;;  %p438_p9 = scmp.lt.s32.totalorder %s570_s22, %s614_s2 }
  0xe4   : > { %p439_p10 = scmp.lt.s32.totalorder %s437_s30, %s433_s27 }
  0xe5   : > { %p435_p7 = pnand %p434_p4, %p537_p5 }
  0xe6   : > { %p440_p11 = por %p439_p10, %p438_p9 }
  0xe7   : > { %p436_p8 = pneg %p435_p7 }
  0xe9   : > { %p441_p12 = pnand %p440_p11, %p436_p8 }
  0xeb   : > { %444 = shalt.err (!%p441_p12)
}
  0xec   : > { %s482_s5 = smov 128   ;;  %s483_s6 = smov 8  }
  0xed   : > { %378 = dma.vmem_to_hbm [thread:$0]  (%p537_p5), %s565_s14, 512, %s570_s22, %s572_s23, %s482_s5, %s482_s5, %s483_s6  }
  0xee PF: > { %p384_p13 = scmp.ge.s32.totalorder %s479_s12, 2  ;;  %s284_s7 = sand.u32 1, %s467_s9  }
  0xef   : > { %s285_s8 = scalar_lea.sflag [#allocation3], %s284_s7 }
  0xf0   : > { %p381_p0 = pnand %p384_p13, %p541_p6 }
  0xf2   : > { %p382_p1 = pneg %p381_p0 }
  0xf4   : > { %462 = dma.done.wait (%p382_p1), %s285_s8, 512  }
  0xf5   : > { %464 = vsyncadd (%p382_p1), %s285_s8, 4294966784  ;;  %p12_p2 = scmp.ge.s32.totalorder %s524_s15, 4   ;;  %s617_s9 = smov %s471_s10 }
  0xf6   : > { %s618_s10 = smov %s475_s11  ;;  %s619_s11 = smov %s535_s18 }
  0xf7   : > { %s620_s12 = smov %s524_s15  ;;  %14 = sbr.rel (!%p12_p2) target bundleno = 3 (0x3), region = 63 }
  0xfc   :  { %290 = vsyncpa [#allocation3], 1 }
  0xfd   :  { %292 = vsyncpa [#allocation3 + $0x1], 1 }

</bundles_post_ra>
